<compile_context>
chip_gen: v5e
topology: v5e:2x2
jax: 0.10.0
libtpu: 0.0.40
codegen_flags: <defaults>
</compile_context>

<pallas_src>
import jax
import jax.numpy as jnp
from jax.experimental import pallas as pl
from jax.experimental.pallas import tpu as pltpu


def _mm(a, w_ref):
    # Cast activation to the (bf16) weight dtype for the MXU, accumulate in f32.
    return jnp.dot(a.astype(w_ref.dtype), w_ref[...],
                   preferred_element_type=jnp.float32)


# ---------------------------------------------------------------------------
# Kernels
# ---------------------------------------------------------------------------
def simskip_proj_kernel(x_ref,
                        w1_ref, t1_ref,
                        w2_ref, t2_ref,
                        w3_ref, b3_ref,
                        w4_ref, b4_ref,
                        w5_ref, b5_ref,
                        proj_ref):
    """Encoder + projector. BN/bias already folded into (W', t')."""
    x = x_ref[...].astype(jnp.float32)

    h1 = jnp.maximum(_mm(x, w1_ref) + t1_ref[...], 0.0)       # layer1: Linear+BN+ReLU
    h2 = jnp.maximum(_mm(h1, w2_ref) + t2_ref[...], 0.0)      # layer2: Linear+BN+ReLU
    enc = _mm(h2, w3_ref) + b3_ref[...] + x                    # encoder.linear + skip

    p1 = jnp.maximum(_mm(enc, w4_ref) + b4_ref[...], 0.0)      # projector.layer1 + ReLU
    proj_ref[...] = (_mm(p1, w5_ref) + b5_ref[...]).astype(proj_ref.dtype)


def simskip_enc_kernel(x_ref,
                       w1_ref, t1_ref,
                       w2_ref, t2_ref,
                       w3_ref, b3_ref,
                       enc_ref):
    """Encoder only (use_projector=False, eval): no dead projector work."""
    x = x_ref[...].astype(jnp.float32)
    h1 = jnp.maximum(_mm(x, w1_ref) + t1_ref[...], 0.0)
    h2 = jnp.maximum(_mm(h1, w2_ref) + t2_ref[...], 0.0)
    enc_ref[...] = (_mm(h2, w3_ref) + b3_ref[...] + x).astype(enc_ref.dtype)


# ---------------------------------------------------------------------------
# Parameter construction / folding (plain-JAX glue, one-time host-side work)
# ---------------------------------------------------------------------------
def init_params(key, input_dim, projection_dim):
    """Deterministic synthetic parameters (shapes match the PyTorch module)."""
    hidden = input_dim // 2
    ks = jax.random.split(key, 7)

    def lin(k, fan_in, fan_out):
        kw, kb = jax.random.split(k)
        bound = 1.0 / jnp.sqrt(fan_in)
        w = jax.random.uniform(kw, (fan_in, fan_out), jnp.float32, -bound, bound)
        b = jax.random.uniform(kb, (1, fan_out), jnp.float32, -bound, bound)
        return w, b

    def bn(k, dim, eps=1e-4):
        kg, kb, km, kv = jax.random.split(k, 4)
        gamma = 1.0 + 0.1 * jax.random.normal(kg, (dim,), jnp.float32)
        beta = 0.1 * jax.random.normal(kb, (dim,), jnp.float32)
        rmean = 0.1 * jax.random.normal(km, (dim,), jnp.float32)
        rvar = 1.0 + 0.1 * jax.random.uniform(kv, (dim,), jnp.float32)
        scale = gamma / jnp.sqrt(rvar + eps)
        shift = beta - rmean * scale
        return scale.reshape(1, dim), shift.reshape(1, dim)

    w1, b1 = lin(ks[0], input_dim, hidden)          # encoder.layer1 Linear
    s1, t1 = bn(ks[1], hidden)                      # encoder.layer1 BatchNorm1d
    w2, b2 = lin(ks[2], hidden, input_dim)          # encoder.layer2 Linear
    s2, t2 = bn(ks[3], input_dim)                   # encoder.layer2 BatchNorm1d
    w3, b3 = lin(ks[4], input_dim, input_dim)       # encoder.linear
    w4, b4 = lin(ks[5], input_dim, input_dim)       # projector.layer1
    w5, b5 = lin(ks[6], input_dim, projection_dim)  # projector.layer2
    return (w1, b1, s1, t1, w2, b2, s2, t2, w3, b3, w4, b4, w5, b5)


def fold_params(raw, weight_dtype=jnp.bfloat16):
    """Fold eval-mode BN (scale, shift) and Linear bias into (W', t'); cast
    weights to bf16 for the MXU, keep bias/shift epilogues in f32."""
    (w1, b1, s1, t1, w2, b2, s2, t2, w3, b3, w4, b4, w5, b5) = raw
    w1f = (w1 * s1).astype(weight_dtype)            # column-wise BN scale fold
    t1f = (b1 * s1 + t1).astype(jnp.float32)
    w2f = (w2 * s2).astype(weight_dtype)
    t2f = (b2 * s2 + t2).astype(jnp.float32)
    return (w1f, t1f, w2f, t2f,
            w3.astype(weight_dtype), b3.astype(jnp.float32),
            w4.astype(weight_dtype), b4.astype(jnp.float32),
            w5.astype(weight_dtype), b5.astype(jnp.float32))


# ---------------------------------------------------------------------------
# Wrapper
# ---------------------------------------------------------------------------
def simskip_forward(x, folded, use_projector=True, block_batch=256):
    B, D = x.shape
    P = folded[-2].shape[1]

    # Pick a batch tile: multiple of 8, dividing the (possibly padded) batch.
    TB = max(8, min(block_batch, ((B + 7) // 8) * 8))
    B_pad = ((B + TB - 1) // TB) * TB
    if B_pad != B:
        x_in = jnp.concatenate(
            [x, jnp.zeros((B_pad - B, D), x.dtype)], axis=0)
    else:
        x_in = x
    grid = (B_pad // TB,)

    def resident_spec(a):
        # Full array as one block, constant index_map -> stays in VMEM.
        return pl.BlockSpec(a.shape, lambda i: (0,) * a.ndim)

    x_spec = pl.BlockSpec((TB, D), lambda i: (i, 0))

    if use_projector:
        kernel = simskip_proj_kernel
        params = folded
        out_cols = P
        flops = 2 * B_pad * (D * (D // 2) + (D // 2) * D + D * D + D * D + D * P)
    else:
        kernel = simskip_enc_kernel
        params = folded[:6]
        out_cols = D
        flops = 2 * B_pad * (D * (D // 2) + (D // 2) * D + D * D)

    out_shape = jax.ShapeDtypeStruct((B_pad, out_cols), x.dtype)
    out_spec = pl.BlockSpec((TB, out_cols), lambda i: (i, 0))

    param_bytes = sum(int(p.size) * p.dtype.itemsize for p in params)
    tile_bytes = (TB * D + TB * out_cols) * x.dtype.itemsize
    bytes_accessed = (int(x_in.size) * x.dtype.itemsize
                      + param_bytes
                      + B_pad * out_cols * x.dtype.itemsize)
    # Resident weights (possibly double-buffered) + double-buffered x/out tiles
    # + generous scratch headroom; clamp so it always fits v7x's 64 MiB VMEM.
    vmem_limit = min(max(2 * param_bytes + 2 * tile_bytes + (8 << 20), 16 << 20),
                     60 << 20)

    out = pl.pallas_call(
        kernel,
        out_shape=out_shape,
        grid=grid,
        in_specs=[x_spec] + [resident_spec(p) for p in params],
        out_specs=out_spec,
        compiler_params=pltpu.CompilerParams(
            dimension_semantics=("parallel",),
            vmem_limit_bytes=int(vmem_limit),
        ),
        cost_estimate=pl.CostEstimate(
            flops=int(flops), transcendentals=0,
            bytes_accessed=int(bytes_accessed)),
    )(x_in, *params)

    return out[:B] if B_pad != B else out


# ---------------------------------------------------------------------------
# Pure-JAX reference (same folding / bf16 casting -> tight tolerance)
# ---------------------------------------------------------------------------
def simskip_reference(x, folded, use_projector=True):
    (w1f, t1f, w2f, t2f, w3, b3, w4, b4, w5, b5) = folded

    def mm(a, w):
        return jnp.dot(a.astype(w.dtype), w, preferred_element_type=jnp.float32)

    x = x.astype(jnp.float32)
    h1 = jnp.maximum(mm(x, w1f) + t1f, 0.0)
    h2 = jnp.maximum(mm(h1, w2f) + t2f, 0.0)
    enc = mm(h2, w3) + b3 + x
    if not use_projector:
        return enc
    p1 = jnp.maximum(mm(enc, w4) + b4, 0.0)
    return mm(p1, w5) + b5


if __name__ == "__main__":
    # Small but lane-dense shapes: D=256 -> hidden=128, P=128 (module default),
    # B=16 with TB=8 so the batch grid (2 steps) is actually exercised.
    B, D, P = 16, 256, 128
    TB = 8

    key = jax.random.PRNGKey(0)
    kx, kp = jax.random.split(key)
    x = jax.random.normal(kx, (B, D), jnp.float32)
    raw = init_params(kp, D, P)
    folded = fold_params(raw)

    # training / use_projector=True path: encoder + projector
    out = simskip_forward(x, folded, use_projector=True, block_batch=TB)
    jax.block_until_ready(out)
    assert out.shape == (B, P)
    ref = simskip_reference(x, folded, use_projector=True)
    assert jnp.allclose(out, ref, atol=2e-2, rtol=2e-2), "projector path mismatch"

    # eval / use_projector=False path: encoder only (no projector compiled in)
    enc = simskip_forward(x, folded, use_projector=False, block_batch=TB)
    jax.block_until_ready(enc)
    assert enc.shape == (B, D)
    enc_ref = simskip_reference(x, folded, use_projector=False)
    assert jnp.allclose(enc, enc_ref, atol=2e-2, rtol=2e-2), "encoder path mismatch"

    # TODO(synk): training-mode Dropout / batch-stat BatchNorm and the
    # ContrastiveLoss / optimizer steps are out of scope for a forward kernel.
    print("KERNEL_OK")
</pallas_src>

<mosaic_0001>
module attributes {stable_mosaic.version = 11 : i64} {
  func.func @simskip_proj_kernel(%arg0: i32, %arg1: memref<8x256xf32, #tpu.memory_space<vmem>>, %arg2: memref<256x128xbf16, #tpu.memory_space<vmem>>, %arg3: memref<1x128xf32, #tpu.memory_space<vmem>>, %arg4: memref<128x256xbf16, #tpu.memory_space<vmem>>, %arg5: memref<1x256xf32, #tpu.memory_space<vmem>>, %arg6: memref<256x256xbf16, #tpu.memory_space<vmem>>, %arg7: memref<1x256xf32, #tpu.memory_space<vmem>>, %arg8: memref<256x256xbf16, #tpu.memory_space<vmem>>, %arg9: memref<1x256xf32, #tpu.memory_space<vmem>>, %arg10: memref<256x128xbf16, #tpu.memory_space<vmem>>, %arg11: memref<1x128xf32, #tpu.memory_space<vmem>>, %arg12: memref<8x128xf32, #tpu.memory_space<vmem>>) attributes {dimension_semantics = [#tpu.dimension_semantics<parallel>], iteration_bounds = array<i64: 2>, scalar_prefetch = 0 : i64, scratch_operands = 0 : i64, tpu.core_type = #tpu.core_type<tc>, window_params = [{transform_indices = @transform_0, window_bounds = array<i64: 8, 256>}, {pipeline_mode = #tpu.pipeline_mode<synchronous>, transform_indices = @transform_1, window_bounds = array<i64: 256, 128>}, {pipeline_mode = #tpu.pipeline_mode<synchronous>, transform_indices = @transform_2, window_bounds = array<i64: 1, 128>}, {pipeline_mode = #tpu.pipeline_mode<synchronous>, transform_indices = @transform_3, window_bounds = array<i64: 128, 256>}, {pipeline_mode = #tpu.pipeline_mode<synchronous>, transform_indices = @transform_4, window_bounds = array<i64: 1, 256>}, {pipeline_mode = #tpu.pipeline_mode<synchronous>, transform_indices = @transform_5, window_bounds = array<i64: 256, 256>}, {pipeline_mode = #tpu.pipeline_mode<synchronous>, transform_indices = @transform_6, window_bounds = array<i64: 1, 256>}, {pipeline_mode = #tpu.pipeline_mode<synchronous>, transform_indices = @transform_7, window_bounds = array<i64: 256, 256>}, {pipeline_mode = #tpu.pipeline_mode<synchronous>, transform_indices = @transform_8, window_bounds = array<i64: 1, 256>}, {pipeline_mode = #tpu.pipeline_mode<synchronous>, transform_indices = @transform_9, window_bounds = array<i64: 256, 128>}, {pipeline_mode = #tpu.pipeline_mode<synchronous>, transform_indices = @transform_10, window_bounds = array<i64: 1, 128>}, {transform_indices = @transform_11, window_bounds = array<i64: 8, 128>}]} {
    %c0 = arith.constant 0 : index
    %c0_0 = arith.constant 0 : index
    %0 = vector.load %arg1[%c0, %c0_0] : memref<8x256xf32, #tpu.memory_space<vmem>>, vector<8x256xf32>
    %1 = arith.truncf %0 : vector<8x256xf32> to vector<8x256xbf16>
    %c0_1 = arith.constant 0 : index
    %c0_2 = arith.constant 0 : index
    %2 = vector.load %arg2[%c0_1, %c0_2] : memref<256x128xbf16, #tpu.memory_space<vmem>>, vector<256x128xbf16>
    %cst = arith.constant dense<0.000000e+00> : vector<8x128xf32>
    %3 = tpu.matmul %1, %2, %cst {dimension_numbers = #tpu.dot_dimension_numbers<[1], [0], [0], [1], [0, 0, 1, 1], [], []>} : vector<8x256xbf16>, vector<256x128xbf16>, vector<8x128xf32> -> vector<8x128xf32>
    %c0_3 = arith.constant 0 : index
    %c0_4 = arith.constant 0 : index
    %4 = vector.load %arg3[%c0_3, %c0_4] : memref<1x128xf32, #tpu.memory_space<vmem>>, vector<1x128xf32>
    %5 = vector.broadcast %4 : vector<1x128xf32> to vector<8x128xf32>
    %6 = arith.addf %3, %5 : vector<8x128xf32>
    %cst_5 = arith.constant 0.000000e+00 : f32
    %7 = vector.broadcast %cst_5 : f32 to vector<8x128xf32>
    %8 = arith.maximumf %6, %7 : vector<8x128xf32>
    %9 = arith.truncf %8 : vector<8x128xf32> to vector<8x128xbf16>
    %c0_6 = arith.constant 0 : index
    %c0_7 = arith.constant 0 : index
    %10 = vector.load %arg4[%c0_6, %c0_7] : memref<128x256xbf16, #tpu.memory_space<vmem>>, vector<128x256xbf16>
    %cst_8 = arith.constant dense<0.000000e+00> : vector<8x256xf32>
    %11 = tpu.matmul %9, %10, %cst_8 {dimension_numbers = #tpu.dot_dimension_numbers<[1], [0], [0], [1], [0, 0, 1, 1], [], []>} : vector<8x128xbf16>, vector<128x256xbf16>, vector<8x256xf32> -> vector<8x256xf32>
    %c0_9 = arith.constant 0 : index
    %c0_10 = arith.constant 0 : index
    %12 = vector.load %arg5[%c0_9, %c0_10] : memref<1x256xf32, #tpu.memory_space<vmem>>, vector<1x256xf32>
    %13 = vector.broadcast %12 : vector<1x256xf32> to vector<8x256xf32>
    %14 = arith.addf %11, %13 : vector<8x256xf32>
    %cst_11 = arith.constant 0.000000e+00 : f32
    %15 = vector.broadcast %cst_11 : f32 to vector<8x256xf32>
    %16 = arith.maximumf %14, %15 : vector<8x256xf32>
    %17 = arith.truncf %16 : vector<8x256xf32> to vector<8x256xbf16>
    %c0_12 = arith.constant 0 : index
    %c0_13 = arith.constant 0 : index
    %18 = vector.load %arg6[%c0_12, %c0_13] : memref<256x256xbf16, #tpu.memory_space<vmem>>, vector<256x256xbf16>
    %cst_14 = arith.constant dense<0.000000e+00> : vector<8x256xf32>
    %19 = tpu.matmul %17, %18, %cst_14 {dimension_numbers = #tpu.dot_dimension_numbers<[1], [0], [0], [1], [0, 0, 1, 1], [], []>} : vector<8x256xbf16>, vector<256x256xbf16>, vector<8x256xf32> -> vector<8x256xf32>
    %c0_15 = arith.constant 0 : index
    %c0_16 = arith.constant 0 : index
    %20 = vector.load %arg7[%c0_15, %c0_16] : memref<1x256xf32, #tpu.memory_space<vmem>>, vector<1x256xf32>
    %21 = vector.broadcast %20 : vector<1x256xf32> to vector<8x256xf32>
    %22 = arith.addf %19, %21 : vector<8x256xf32>
    %23 = arith.addf %22, %0 : vector<8x256xf32>
    %24 = arith.truncf %23 : vector<8x256xf32> to vector<8x256xbf16>
    %c0_17 = arith.constant 0 : index
    %c0_18 = arith.constant 0 : index
    %25 = vector.load %arg8[%c0_17, %c0_18] : memref<256x256xbf16, #tpu.memory_space<vmem>>, vector<256x256xbf16>
    %cst_19 = arith.constant dense<0.000000e+00> : vector<8x256xf32>
    %26 = tpu.matmul %24, %25, %cst_19 {dimension_numbers = #tpu.dot_dimension_numbers<[1], [0], [0], [1], [0, 0, 1, 1], [], []>} : vector<8x256xbf16>, vector<256x256xbf16>, vector<8x256xf32> -> vector<8x256xf32>
    %c0_20 = arith.constant 0 : index
    %c0_21 = arith.constant 0 : index
    %27 = vector.load %arg9[%c0_20, %c0_21] : memref<1x256xf32, #tpu.memory_space<vmem>>, vector<1x256xf32>
    %28 = vector.broadcast %27 : vector<1x256xf32> to vector<8x256xf32>
    %29 = arith.addf %26, %28 : vector<8x256xf32>
    %cst_22 = arith.constant 0.000000e+00 : f32
    %30 = vector.broadcast %cst_22 : f32 to vector<8x256xf32>
    %31 = arith.maximumf %29, %30 : vector<8x256xf32>
    %32 = arith.truncf %31 : vector<8x256xf32> to vector<8x256xbf16>
    %c0_23 = arith.constant 0 : index
    %c0_24 = arith.constant 0 : index
    %33 = vector.load %arg10[%c0_23, %c0_24] : memref<256x128xbf16, #tpu.memory_space<vmem>>, vector<256x128xbf16>
    %cst_25 = arith.constant dense<0.000000e+00> : vector<8x128xf32>
    %34 = tpu.matmul %32, %33, %cst_25 {dimension_numbers = #tpu.dot_dimension_numbers<[1], [0], [0], [1], [0, 0, 1, 1], [], []>} : vector<8x256xbf16>, vector<256x128xbf16>, vector<8x128xf32> -> vector<8x128xf32>
    %c0_26 = arith.constant 0 : index
    %c0_27 = arith.constant 0 : index
    %35 = vector.load %arg11[%c0_26, %c0_27] : memref<1x128xf32, #tpu.memory_space<vmem>>, vector<1x128xf32>
    %36 = vector.broadcast %35 : vector<1x128xf32> to vector<8x128xf32>
    %37 = arith.addf %34, %36 : vector<8x128xf32>
    %c0_28 = arith.constant 0 : index
    %c0_29 = arith.constant 0 : index
    %38 = vector.load %arg12[%c0_28, %c0_29] : memref<8x128xf32, #tpu.memory_space<vmem>>, vector<8x128xf32>
    tpu.vector_store %arg12[%c0_28, %c0_29], %37 {strides = array<i32>} : memref<8x128xf32, #tpu.memory_space<vmem>>, vector<8x128xf32>,
    return
  }
  func.func @transform_0(%arg0: i32) -> (i32, i32) {
    %c0_i32 = arith.constant 0 : i32
    %c0_i32_0 = arith.constant 0 : i32
    return %arg0, %c0_i32 : i32, i32
  }
  func.func @transform_1(%arg0: i32) -> (i32, i32) {
    %c0_i32 = arith.constant 0 : i32
    %c0_i32_0 = arith.constant 0 : i32
    %c0_i32_1 = arith.constant 0 : i32
    return %c0_i32, %c0_i32_0 : i32, i32
  }
  func.func @transform_2(%arg0: i32) -> (i32, i32) {
    %c0_i32 = arith.constant 0 : i32
    %c0_i32_0 = arith.constant 0 : i32
    %c0_i32_1 = arith.constant 0 : i32
    return %c0_i32, %c0_i32_0 : i32, i32
  }
  func.func @transform_3(%arg0: i32) -> (i32, i32) {
    %c0_i32 = arith.constant 0 : i32
    %c0_i32_0 = arith.constant 0 : i32
    %c0_i32_1 = arith.constant 0 : i32
    return %c0_i32, %c0_i32_0 : i32, i32
  }
  func.func @transform_4(%arg0: i32) -> (i32, i32) {
    %c0_i32 = arith.constant 0 : i32
    %c0_i32_0 = arith.constant 0 : i32
    %c0_i32_1 = arith.constant 0 : i32
    return %c0_i32, %c0_i32_0 : i32, i32
  }
  func.func @transform_5(%arg0: i32) -> (i32, i32) {
    %c0_i32 = arith.constant 0 : i32
    %c0_i32_0 = arith.constant 0 : i32
    %c0_i32_1 = arith.constant 0 : i32
    return %c0_i32, %c0_i32_0 : i32, i32
  }
  func.func @transform_6(%arg0: i32) -> (i32, i32) {
    %c0_i32 = arith.constant 0 : i32
    %c0_i32_0 = arith.constant 0 : i32
    %c0_i32_1 = arith.constant 0 : i32
    return %c0_i32, %c0_i32_0 : i32, i32
  }
  func.func @transform_7(%arg0: i32) -> (i32, i32) {
    %c0_i32 = arith.constant 0 : i32
    %c0_i32_0 = arith.constant 0 : i32
    %c0_i32_1 = arith.constant 0 : i32
    return %c0_i32, %c0_i32_0 : i32, i32
  }
  func.func @transform_8(%arg0: i32) -> (i32, i32) {
    %c0_i32 = arith.constant 0 : i32
    %c0_i32_0 = arith.constant 0 : i32
    %c0_i32_1 = arith.constant 0 : i32
    return %c0_i32, %c0_i32_0 : i32, i32
  }
  func.func @transform_9(%arg0: i32) -> (i32, i32) {
    %c0_i32 = arith.constant 0 : i32
    %c0_i32_0 = arith.constant 0 : i32
    %c0_i32_1 = arith.constant 0 : i32
    return %c0_i32, %c0_i32_0 : i32, i32
  }
  func.func @transform_10(%arg0: i32) -> (i32, i32) {
    %c0_i32 = arith.constant 0 : i32
    %c0_i32_0 = arith.constant 0 : i32
    %c0_i32_1 = arith.constant 0 : i32
    return %c0_i32, %c0_i32_0 : i32, i32
  }
  func.func @transform_11(%arg0: i32) -> (i32, i32) {
    %c0_i32 = arith.constant 0 : i32
    %c0_i32_0 = arith.constant 0 : i32
    return %arg0, %c0_i32 : i32, i32
  }
}

</mosaic_0001>

<bundles_post_ra>
// kernel: tpu_custom_call.1
= control target key start
LH: loop header
LB: loop body
LE: loop exit
PB: predicated region body
PF: predicated region fallthrough
CT: control target
= control target key end

     0   :  { %s2881_s0 = inlined_call_operand.hbm [shape: f32[16,256], index: 0, kind: input, shape index: {}]   ;;  %s2882_s1 = inlined_call_operand.hbm [shape: bf16[256,128], index: 1, kind: input, shape index: {}]   ;;  %s2883_s2 = inlined_call_operand.hbm [shape: f32[1,128], index: 2, kind: input, shape index: {}]   ;;  %s2884_s3 = inlined_call_operand.hbm [shape: bf16[128,256], index: 3, kind: input, shape index: {}]   ;;  %s2885_s4 = inlined_call_operand.vmem [shape: f32[1,256], index: 4, kind: input, shape index: {}]   ;;  %s2886_s5 = inlined_call_operand.hbm [shape: bf16[256,256], index: 5, kind: input, shape index: {}]   ;;  %s2887_s6 = inlined_call_operand.vmem [shape: f32[1,256], index: 6, kind: input, shape index: {}]   ;;  %s2888_s7 = inlined_call_operand.hbm [shape: bf16[256,256], index: 7, kind: input, shape index: {}]   ;;  %s2889_s8 = inlined_call_operand.vmem [shape: f32[1,256], index: 8, kind: input, shape index: {}]   ;;  %s2890_s9 = inlined_call_operand.hbm [shape: bf16[256,128], index: 9, kind: input, shape index: {}]   ;;  %s2891_s10 = inlined_call_operand.vmem [shape: f32[1,128], index: 10, kind: input, shape index: {}]   ;;  %s2892_s11 = inlined_call_operand.hbm [shape: f32[16,128], index: 11, kind: output, shape index: {}]  }
   0x1   :  { %2894 = sst [smem:[#allocation20_spill]] %s2882_s1 }
   0x2   :  { %2895 = sst [smem:[#allocation21_spill]] %s2883_s2 }
   0x3   :  { %2896 = sst [smem:[#allocation22_spill]] %s2884_s3 }
   0x4   :  { %2897 = sst [smem:[#allocation23_spill]] %s2886_s5 }
   0x5   :  { %2898 = sst [smem:[#allocation24_spill]] %s2891_s10 }
   0x6   :  { %2899 = sst [smem:[#allocation25_spill]] %s2892_s11 }
   0x7   :  { %16 = vsyncpa [#allocation3], 0 }
   0x8   :  { %18 = vsyncpa [#allocation3 + $0x1], 0 }
   0x9   :  { %19 = vsyncpa [#allocation6], 0 }
   0xa   :  { %20 = vsyncpa [#allocation9], 0 }
   0xb   :  { %21 = vsyncpa [#allocation12], 0 }
   0xc   :  { %22 = vsyncpa [#allocation4], 0 }
   0xd   :  { %24 = vsyncpa [#allocation4 + $0x1], 0  ;;  %s2667_s17 = smov 0   ;;  %s2669_s18 = smov 0  }
   0xe   :  { %s2671_s19 = smov 0   ;;  %s2673_s20 = smov 0  }
   0xf LB: > { %s2900_s1 = sld [smem:[#allocation20_spill]]  ;;  %s2691_s24 = sadd.s32 4294967295, %s2595_s20   ;;  %s2595_s20 = sphi %s2673_s20, %s2917_s20   ;;  %s2591_s19 = sphi %s2671_s19, %s2916_s19   ;;  %s2587_s18 = sphi %s2669_s18, %s2915_s18   ;;  %s2583_s17 = sphi %s2667_s17, %s2914_s17  }
  0x10   : > { %p1609_p0 = scmp.ge.s32.totalorder %s2595_s20, 1  ;;  %p51_p1 = scmp.eq.s32.totalorder %s2691_s24, 0 }
  0x11   : > { %p297_p2 = scmp.lt.s32.totalorder %s2595_s20, 3  ;;  %s2597_s26 = smov [#allocation5]  }
  0x12   : > { %s310_s27 = sshll.u32 %s2597_s26, 4  ;;  %s2902_s3 = sld [smem:[#allocation22_spill]]  ;;  %s311_s27 = int_to_ptr.vmem [resolvable:$true] %s310_s27 }
  0x13   : > { %p2696_p3 = pnand %p1609_p0, %p297_p2  ;;  %s2598_s13 = smov [#allocation8]  }
  0x14   : > { %s336_s14 = sshll.u32 %s2598_s13, 4  ;;  %s2599_s15 = smov 64   ;;  %s337_s14 = int_to_ptr.vmem [resolvable:$true] %s336_s14 }
  0x15   : > { %s308_s23 = sshll.u32 %s2900_s1, 4  ;;  %p2222_p4 = pneg %p2696_p3  ;;  %s309_s23 = int_to_ptr.hbm [resolvable:$true] %s308_s23 }
  0x16   : > { %s2600_s16 = smov 4   ;;  %s2601_s21 = smov 128  }
  0x17   : > { %p2708_p6 = pnand %p2222_p4, %p51_p1  ;;  %s2602_s22 = smov 8  }
  0x18   : > { %s334_s30 = sshll.u32 %s2902_s3, 4  ;;  %s368_s29 = sshll.u32 %s2888_s7, 4  ;;  %s335_s30 = int_to_ptr.hbm [resolvable:$true] %s334_s30  ;;  %s369_s29 = int_to_ptr.hbm [resolvable:$true] %s368_s29 }
  0x19   : > { %2225 = dma.hbm_to_vmem [thread:$0]  (!%p2708_p6), %s309_s23, 2048, %s311_s27, [#allocation6], %s2599_s15, %s2599_s15, %s2600_s16  }
  0x1a   : > { %2231 = dma.hbm_to_vmem [thread:$0]  (!%p2708_p6), %s335_s30, 2048, %s337_s14, [#allocation9], %s2601_s21, %s2601_s21, %s2602_s22  }
  0x1b   : > { %s2603_s1 = smov [#allocation11]   ;;  %s2904_s2 = sld [smem:[#allocation21_spill]] }
  0x1c   : > { %s370_s13 = sshll.u32 %s2603_s1, 4  ;;  %s2604_s23 = smov [#allocation7]   ;;  %s371_s13 = int_to_ptr.vmem [resolvable:$true] %s370_s13 }
  0x1d   : > { %2237 = dma.hbm_to_vmem [thread:$0]  (!%p2708_p6), %s369_s29, 4096, %s371_s13, [#allocation12], %s2601_s21, %s2601_s21, %s2602_s22  }
  0x1e   : > { %s325_s27 = sshll.u32 %s2604_s23, 4  ;;  %s2905_s5 = sld [smem:[#allocation23_spill]]  ;;  %s326_s27 = int_to_ptr.vmem [resolvable:$true] %s325_s27 }
  0x1f   : > { %s385_s11 = sshll.u32 %s2890_s9, 4  ;;  %s2605_s28 = smov [#allocation10]   ;;  %s386_s11 = int_to_ptr.hbm [resolvable:$true] %s385_s11 }
  0x20   : > { %s353_s29 = sshll.u32 %s2605_s28, 4  ;;  %s2606_s13 = smov [#allocation13]   ;;  %s354_s29 = int_to_ptr.vmem [resolvable:$true] %s353_s29 }
  0x21   : > { %s323_s10 = sshll.u32 %s2904_s2, 4  ;;  %s1608_s23 = sadd.s32 4294967294, %s2595_s20   ;;  %s324_s10 = int_to_ptr.hbm [resolvable:$true] %s323_s10 }
  0x22   : > { %2228 = dma.hbm_to_vmem [thread:$0]  (!%p2708_p6), %s324_s10, 16, %s326_s27, [#allocation6]  }
  0x23   : > { %s387_s10 = sshll.u32 %s2606_s13, 4  ;;  %s2744_s27 = sadd.s32 1, %s2595_s20   ;;  %s388_s10 = int_to_ptr.vmem [resolvable:$true] %s387_s10 }
  0x24   : > { %s351_s26 = sshll.u32 %s2905_s5, 4  ;;  %s34_s30 = ssub.s32 %s2595_s20, %s2744_s27  ;;  %s352_s26 = int_to_ptr.hbm [resolvable:$true] %s351_s26 }
  0x25   : > { %2234 = dma.hbm_to_vmem [thread:$0]  (!%p2708_p6), %s352_s26, 4096, %s354_s29, [#allocation9], %s2601_s21, %s2601_s21, %s2602_s22  }
  0x26   : > { %2240 = dma.hbm_to_vmem [thread:$0]  (!%p2708_p6), %s386_s11, 2048, %s388_s10, [#allocation12], %s2599_s15, %s2599_s15, %s2600_s16  }
  0x27   : > { %s37_s14 = sadd.s32 1, %s2591_s19  ;;  %p35_p7 = scmp.eq.s32.totalorder %s34_s30, 0 }
  0x28   : > { %p44_p8 = scmp.ne.s32.totalorder %s2591_s19, %s2587_s18  ;;  %p45_p9 = scmp.eq.s32.totalorder %s2595_s20, 0 }
  0x29   : > { %p50_p10 = scmp.ne.s32.totalorder %s2587_s18, %s2583_s17  ;;  %p284_p13 = scmp.eq.s32.totalorder %s2691_s24, 1 }
  0x2a   : > { %s2755_s21 = scalar_select %p35_p7, %s2591_s19, %s37_s14  }
  0x2b   : > { %p2757_p11 = por %p45_p9, %p44_p8  ;;  %p2763_p12 = por %p51_p1, %p50_p10 }
  0x2c   : > { %p290_p0 = scmp.eq.s32.totalorder %s1608_s23, 1  ;;  %p2255_p2 = scmp.lt.s32.totalorder %s2595_s20, 2 }
  0x2d   : > { %s404_s16 = sand.u32 1, %s2591_s19   ;;  %p2770_p4 = por %p284_p13, %p44_p8 }
  0x2e   : > { %p2774_p6 = por %p290_p0, %p50_p10  ;;  %s1617_s1 = sshll.u32 %s404_s16, 4 }
  0x2f   : > { %s2081_s3 = sshll.u32 %s2595_s20, 4  ;;  %s408_s13 = scalar_lea.vmem [#allocation2], %s1617_s1 }
  0x30   : > { %s413_s29 = scalar_lea.hbm %s2881_s0, %s2081_s3  ;;  %s417_s10 = sshll.u32 %s408_s13, 4  ;;  %s418_s10 = int_to_ptr.vmem [resolvable:$true] %s417_s10 }
  0x31   : > { %s415_s30 = sshll.u32 %s413_s29, 4  ;;  %p2784_p7 = pnand %p2255_p2, %p2757_p11  ;;  %s416_s30 = int_to_ptr.hbm [resolvable:$true] %s415_s30 }
  0x32   : > { %s405_s14 = scalar_lea.sflag [#allocation3], %s404_s16  ;;  %s2487_s2 = sshra.s32 %s416_s30, 4  ;;  %s2488_s2 = int_to_ptr.hbm [resolvable:$true] %s2487_s2 }
  0x33   : > { %s2489_s5 = scalar_lea.hbm %s2488_s2, 16  ;;  %p2491_p9 = pneg %p2784_p7 }
  0x34   : > { %p2490_p8 = scmp.ne.s32.totalorder %s2488_s2, %s2489_s5  ;;  %s2494_s11 = scalar_lea.hbm %s2881_s0, 32 }
  0x35   : > { %p2495_p11 = scmp.lt.s32.totalorder %s2488_s2, %s2881_s0  ;;  %p2496_p0 = scmp.lt.s32.totalorder %s2494_s11, %s2489_s5 }
  0x36   : > { %p2492_p10 = pnand %p2491_p9, %p2490_p8 }
  0x37   : > { %p2497_p2 = por %p2496_p0, %p2495_p11 }
  0x38   : > { %p2493_p13 = pneg %p2492_p10 }
  0x3a   : > { %p2498_p5 = pnand %p2497_p2, %p2493_p13 }
  0x3c   : > { %2501 = shalt.err (!%p2498_p5)
}
  0x3d   : > { %2244 = dma.hbm_to_vmem [thread:$0]  (!%p2784_p7), %s416_s30, 256, %s418_s10, %s405_s14  }
  0x3e   : > { %426 = sbr.rel (%p2696_p3) target bundleno = 791 (0x317), region = 64  ;;  %s2801_s16 = sand.u32 (!%p2696_p3), 1, %s2587_s18  }
  0x3f   : > { %s1621_s29 = sshll.u32 (!%p2696_p3), %s2801_s16, 4  ;;  %s429_s13 = scalar_lea.sflag (!%p2696_p3), [#allocation3], %s2801_s16 }
  0x40   : > { %s2805_s1 = scalar_lea.vmem (!%p2696_p3), [#allocation2], %s1621_s29 }
  0x43   : > { %2562 = dma.done.wait (%p2763_p12), %s429_s13, 256  }
  0x44   : > { %2564 = vsyncadd (%p2763_p12), %s429_s13, 4294967040 }
  0x45   : > { %2566 = dma.done.wait (%p51_p1), [#allocation6], 2064  }
  0x46   : > { %2568 = vsyncadd (%p51_p1), [#allocation6], 4294965232 }
  0x47   : > { %2570 = dma.done.wait (%p51_p1), [#allocation9], 6144  }
  0x48   : > { %2572 = vsyncadd (%p51_p1), [#allocation9], 4294961152 }
  0x49   : > { %2574 = dma.done.wait (%p51_p1), [#allocation12], 6144  }
  0x4a   : > { %2576 = vsyncadd (%p51_p1), [#allocation12], 4294961152  ;;  %v2089_v0 = vld [vmem:[#allocation5 + $0x38] sm:$0xff]  ;;  %v2088_v2 = vld [vmem:[#allocation5 + $0x30] sm:$0xff]  ;;  %s2078_s23 = sshll.u32 %s2691_s24, 3  ;;  %s1628_s14 = sshll.u32 %s2801_s16, 3 }
  0x4b   : > { %v2097_v1 = vld [vmem:[#allocation5 + $0x78] sm:$0xff]  ;;  %638 = vmatpush.bf16.msra.mxu0 %v2089_v0  ;;  %v2096_v3 = vld [vmem:[#allocation5 + $0x70] sm:$0xff]  ;;  %v2087_v4 = vld [vmem:[#allocation5 + $0x28] sm:$0xff]  ;;  %s2911_s28 = sld [smem:[#allocation24_spill]]  ;;  %s501_s2 = scalar_lea.vmem [#allocation14], %s1628_s14 }
  0x4c   : > { %651 = vmatpush.bf16.msra.mxu1 %v2097_v1  ;;  %v2095_v5 = vld [vmem:[#allocation5 + $0x68] sm:$0xff]  ;;  %v1751_v6 = vld [vmem:[#allocation8 + $0x70] sm:$0xf]  ;;  %v2113_v7 = vld [vmem:[#allocation8 + $0x74] sm:$0xf0]  ;;  %s2912_s13 = sld [smem:[#allocation25_spill]] }
  0x4d   : > { %v2112_v8 = vld [vmem:[#allocation8 + $0x74] sm:$0xf]  ;;  %v1752_v9 = vor.u32 %v2113_v7, %v1751_v6  ;;  %v1753_v10 = vld [vmem:[#allocation8 + $0x78] sm:$0xf0]  ;;  %v1743_v11 = vld [vmem:[#allocation8 + $0x60] sm:$0xf] }
  0x4e   : > { %v2111_v12 = vld [vmem:[#allocation8 + $0x64] sm:$0xf0]  ;;  %v1756_v13 = vor.u32 %v2112_v8, %v1753_v10  ;;  %v2110_v14 = vld [vmem:[#allocation8 + $0x64] sm:$0xf]  ;;  %v1745_v15 = vld [vmem:[#allocation8 + $0x68] sm:$0xf0] }
  0x4f   : > { %639 = vmatpush.bf16.msra.mxu0 %v2088_v2  ;;  %v2086_v16 = vld [vmem:[#allocation5 + $0x20] sm:$0xff]  ;;  %768 = vmatpush.bf16.msra.mxu2 %v1752_v9  ;;  %v1744_v17 = vor.u32 %v2111_v12, %v1743_v11  ;;  %v1735_v19 = vld [vmem:[#allocation8 + $0x50] sm:$0xf]  ;;  %v2109_v20 = vld [vmem:[#allocation8 + $0x54] sm:$0xf0]  ;;  %v1748_v21 = vor.u32 %v2110_v14, %v1745_v15  ;;  %s1478_s5 = sshll.u32 %s501_s2, 4  ;;  %s1479_s5 = int_to_ptr.vmem [resolvable:$true] %s1478_s5 }
  0x50   : > { %652 = vmatpush.bf16.msra.mxu1 %v2096_v3  ;;  %v2094_v18 = vld [vmem:[#allocation5 + $0x60] sm:$0xff]  ;;  %781 = vmatpush.bf16.msra.mxu3 %v1756_v13  ;;  %v2108_v22 = vld [vmem:[#allocation8 + $0x54] sm:$0xf]  ;;  %v1736_v26 = vor.u32 %v2109_v20, %v1735_v19  ;;  %v2107_v28 = vld [vmem:[#allocation8 + $0x44] sm:$0xf0]  ;;  %s1466_s24 = scalar_lea.sflag [#allocation4], %s2801_s16 }
  0x51   : > { %v1737_v23 = vld [vmem:[#allocation8 + $0x58] sm:$0xf0]  ;;  %v1727_v27 = vld [vmem:[#allocation8 + $0x40] sm:$0xf]  ;;  %v2106_v30 = vld [vmem:[#allocation8 + $0x44] sm:$0xf] }
  0x52   : > { %v2085_v24 = vld [vmem:[#allocation5 + $0x18] sm:$0xff]  ;;  %v1740_v29 = vor.u32 %v2108_v22, %v1737_v23  ;;  %v1729_v31 = vld [vmem:[#allocation8 + $0x48] sm:$0xf0]  ;;  %v1728_v33 = vor.u32 %v2107_v28, %v1727_v27  ;;  %v1719_v35 = vld [vmem:[#allocation8 + $0x30] sm:$0xf]  ;;  %s2537_s14 = scalar_lea.hbm %s2912_s13, 16 }
  0x53   : > { %640 = vmatpush.bf16.msra.mxu0 %v2087_v4  ;;  %v2093_v25 = vld [vmem:[#allocation5 + $0x58] sm:$0xff]  ;;  %769 = vmatpush.bf16.msra.mxu2 %v1744_v17  ;;  %v2084_v32 = vld [vmem:[#allocation5 + $0x10] sm:$0xff]  ;;  %v1732_v37 = vor.u32 %v2106_v30, %v1729_v31  ;;  %v2083_v40 = vld [vmem:[#allocation5 + $0x8] sm:$0xff] }
  0x54   : > { %653 = vmatpush.bf16.msra.mxu1 %v2095_v5  ;;  %782 = vmatpush.bf16.msra.mxu3 %v1748_v21  ;;  %v2092_v34 = vld [vmem:[#allocation5 + $0x50] sm:$0xff]  ;;  %v2105_v36 = vld [vmem:[#allocation8 + $0x34] sm:$0xf0]  ;;  %v1721_v39 = vld [vmem:[#allocation8 + $0x38] sm:$0xf0] }
  0x55   : > { %v2104_v38 = vld [vmem:[#allocation8 + $0x34] sm:$0xf]  ;;  %v1720_v41 = vor.u32 %v2105_v36, %v1719_v35  ;;  %v2091_v42 = vld [vmem:[#allocation5 + $0x48] sm:$0xff]  ;;  %v1711_v43 = vld [vmem:[#allocation8 + $0x20] sm:$0xf] }
  0x56   : > { %v2103_v44 = vld [vmem:[#allocation8 + $0x24] sm:$0xf0]  ;;  %v1724_v45 = vor.u32 %v2104_v38, %v1721_v39  ;;  %v2102_v46 = vld [vmem:[#allocation8 + $0x24] sm:$0xf]  ;;  %v1713_v47 = vld [vmem:[#allocation8 + $0x28] sm:$0xf0] }
  0x57   : > { %641 = vmatpush.bf16.msra.mxu0 %v2086_v16  ;;  %770 = vmatpush.bf16.msra.mxu2 %v1736_v26  ;;  %v2082_v48 = vld [vmem:[#allocation5] sm:$0xff]  ;;  %v1712_v49 = vor.u32 %v2103_v44, %v1711_v43  ;;  %v2827_v52 = vld [vmem:[%s2805_s1 + $0x8] sm:$0xff]  ;;  %v1716_v53 = vor.u32 %v2102_v46, %v1713_v47  ;;  %v1703_v56 = vld [vmem:[#allocation8 + $0x10] sm:$0xf] }
  0x58   : > { %654 = vmatpush.bf16.msra.mxu1 %v2094_v18  ;;  %783 = vmatpush.bf16.msra.mxu3 %v1740_v29  ;;  %v2090_v50 = vld [vmem:[#allocation5 + $0x40] sm:$0xff]  ;;  %v505_v55 = vpack.c.bf16 %v2827_v52, %v2827_v52  ;;  %v2101_v57 = vld [vmem:[#allocation8 + $0x14] sm:$0xf0]  ;;  %v2100_v58 = vld [vmem:[#allocation8 + $0x14] sm:$0xf] }
  0x59   : > { %v2824_v51 = vld [vmem:[%s2805_s1] sm:$0xff]  ;;  %v1704_v59 = vor.u32 %v2101_v57, %v1703_v56  ;;  %v2099_v63 = vld [vmem:[#allocation8 + $0x4] sm:$0xf0]  ;;  %v2129_v5 = vld [vmem:[#allocation10 + $0x74] sm:$0xf0]  ;;  %s1476_s1 = scalar_lea.hbm %s2912_s13, %s2078_s23 }
  0x5a   : > { %v504_v54 = vpack.c.bf16 %v2824_v51, %v2824_v51  ;;  %v1705_v60 = vld [vmem:[#allocation8 + $0x18] sm:$0xf0]  ;;  %v1695_v62 = vld [vmem:[#allocation8] sm:$0xf]  ;;  %v2098_v0 = vld [vmem:[#allocation8 + $0x4] sm:$0xf] }
  0x5b   : > { %642 = vmatpush.bf16.msra.mxu0 %v2085_v24  ;;  %771 = vmatpush.bf16.msra.mxu2 %v1728_v33  ;;  %v1708_v61 = vor.u32 %v2100_v58, %v1705_v60  ;;  %v1696_v1 = vor.u32 %v2099_v63, %v1695_v62  ;;  %v1697_v2 = vld [vmem:[#allocation8 + $0x8] sm:$0xf0]  ;;  %v1815_v4 = vld [vmem:[#allocation10 + $0x70] sm:$0xf]  ;;  %v2145_v8 = vld [vmem:[#allocation10 + $0xf4] sm:$0xf0] }
  0x5c   : > { %655 = vmatpush.bf16.msra.mxu1 %v2093_v25  ;;  %784 = vmatpush.bf16.msra.mxu3 %v1732_v37  ;;  %v1700_v3 = vor.u32 %v2098_v0, %v1697_v2  ;;  %v1879_v6 = vld [vmem:[#allocation10 + $0xf0] sm:$0xf]  ;;  %v1816_v7 = vor.u32 %v2129_v5, %v1815_v4  ;;  %v2128_v9 = vld [vmem:[#allocation10 + $0x74] sm:$0xf]  ;;  %v1817_v10 = vld [vmem:[#allocation10 + $0x78] sm:$0xf0] }
  0x5d   : > { %v1880_v11 = vor.u32 %v2145_v8, %v1879_v6  ;;  %v1820_v12 = vor.u32 %v2128_v9, %v1817_v10  ;;  %v2144_v13 = vld [vmem:[#allocation10 + $0xf4] sm:$0xf]  ;;  %v1881_v14 = vld [vmem:[#allocation10 + $0xf8] sm:$0xf0]  ;;  %v1807_v15 = vld [vmem:[#allocation10 + $0x60] sm:$0xf] }
  0x5e   : > { %v1884_v16 = vor.u32 %v2144_v13, %v1881_v14  ;;  %v2127_v17 = vld [vmem:[#allocation10 + $0x64] sm:$0xf0]  ;;  %v1871_v18 = vld [vmem:[#allocation10 + $0xe0] sm:$0xf]  ;;  %v2126_v22 = vld [vmem:[#allocation10 + $0x64] sm:$0xf] }
  0x5f   : > { %643 = vmatpush.bf16.msra.mxu0 %v2084_v32  ;;  %772 = vmatpush.bf16.msra.mxu2 %v1720_v41  ;;  %v2143_v19 = vld [vmem:[#allocation10 + $0xe4] sm:$0xf0]  ;;  %v1808_v20 = vor.u32 %v2127_v17, %v1807_v15  ;;  %v1809_v23 = vld [vmem:[#allocation10 + $0x68] sm:$0xf0]  ;;  %v2142_v24 = vld [vmem:[#allocation10 + $0xe4] sm:$0xf] }
  0x60   : > { %656 = vmatpush.bf16.msra.mxu1 %v2092_v34  ;;  %785 = vmatpush.bf16.msra.mxu3 %v1724_v45  ;;  %v1872_v21 = vor.u32 %v2143_v19, %v1871_v18  ;;  %v1812_v25 = vor.u32 %v2126_v22, %v1809_v23  ;;  %v1873_v26 = vld [vmem:[#allocation10 + $0xe8] sm:$0xf0]  ;;  %v1799_v27 = vld [vmem:[#allocation10 + $0x50] sm:$0xf]  ;;  %v2125_v28 = vld [vmem:[#allocation10 + $0x54] sm:$0xf0] }
  0x61   : > { %v1876_v29 = vor.u32 %v2142_v24, %v1873_v26  ;;  %v1863_v30 = vld [vmem:[#allocation10 + $0xd0] sm:$0xf]  ;;  %v2141_v31 = vld [vmem:[#allocation10 + $0xd4] sm:$0xf0]  ;;  %v2124_v32 = vld [vmem:[#allocation10 + $0x54] sm:$0xf]  ;;  %v1800_v33 = vor.u32 %v2125_v28, %v1799_v27 }
  0x62   : > { %v1801_v34 = vld [vmem:[#allocation10 + $0x58] sm:$0xf0]  ;;  %v2140_v35 = vld [vmem:[#allocation10 + $0xd4] sm:$0xf]  ;;  %v1864_v37 = vor.u32 %v2141_v31, %v1863_v30  ;;  %v1791_v39 = vld [vmem:[#allocation10 + $0x40] sm:$0xf] }
  0x63   : > { %644 = vmatpush.bf16.msra.mxu0 %v2083_v40  ;;  %773 = vmatpush.bf16.msra.mxu2 %v1712_v49  ;;  %v1865_v36 = vld [vmem:[#allocation10 + $0xd8] sm:$0xf0]  ;;  %v1804_v38 = vor.u32 %v2124_v32, %v1801_v34  ;;  %v2123_v40 = vld [vmem:[#allocation10 + $0x44] sm:$0xf0]  ;;  %v1855_v41 = vld [vmem:[#allocation10 + $0xc0] sm:$0xf] }
  0x64   : > { %657 = vmatpush.bf16.msra.mxu1 %v2091_v42  ;;  %786 = vmatpush.bf16.msra.mxu3 %v1716_v53  ;;  %v1868_v42 = vor.u32 %v2140_v35, %v1865_v36  ;;  %v2139_v43 = vld [vmem:[#allocation10 + $0xc4] sm:$0xf0]  ;;  %v2122_v44 = vld [vmem:[#allocation10 + $0x44] sm:$0xf]  ;;  %v1793_v45 = vld [vmem:[#allocation10 + $0x48] sm:$0xf0] }
  0x65   : > { %v2138_v46 = vld [vmem:[#allocation10 + $0xc4] sm:$0xf]  ;;  %v1857_v47 = vld [vmem:[#allocation10 + $0xc8] sm:$0xf0]  ;;  %v1856_v49 = vor.u32 %v2139_v43, %v1855_v41  ;;  %v1783_v53 = vld [vmem:[#allocation10 + $0x30] sm:$0xf] }
  0x66   : > { %v1860_v56 = vor.u32 %v2138_v46, %v1857_v47  ;;  %v2137_v57 = vld [vmem:[#allocation10 + $0xb4] sm:$0xf0]  ;;  %v2120_v58 = vld [vmem:[#allocation10 + $0x34] sm:$0xf]  ;;  %v2119_v2 = vld [vmem:[#allocation10 + $0x24] sm:$0xf0] }
  0x67   : > { %645 = vmatpush.bf16.msra.mxu0 %v2082_v48  ;;  %774 = vmatpush.bf16.msra.mxu2 %v1704_v59  ;;  %v1792_v48 = vor.u32 %v2123_v40, %v1791_v39  ;;  %v1785_v59 = vld [vmem:[#allocation10 + $0x38] sm:$0xf0]  ;;  %v2136_v60 = vld [vmem:[#allocation10 + $0xb4] sm:$0xf]  ;;  %v2135_v5 = vld [vmem:[#allocation10 + $0xa4] sm:$0xf0] }
  0x68   : > { %658 = vmatpush.bf16.msra.mxu1 %v2090_v50  ;;  %787 = vmatpush.bf16.msra.mxu3 %v1708_v61  ;;  %v1796_v50 = vor.u32 %v2122_v44, %v1793_v45  ;;  %v1849_v61 = vld [vmem:[#allocation10 + $0xb8] sm:$0xf0]  ;;  %v1788_v0 = vor.u32 %v2120_v58, %v1785_v59  ;;  %v2118_v6 = vld [vmem:[#allocation10 + $0x24] sm:$0xf]  ;;  %v1841_v9 = vld [vmem:[#allocation10 + $0xa8] sm:$0xf0] }
  0x69   : > { %v1852_v4 = vor.u32 %v2136_v60, %v1849_v61  ;;  %v2134_v8 = vld [vmem:[#allocation10 + $0xa4] sm:$0xf]  ;;  %v1767_v23 = vld [vmem:[#allocation10 + $0x10] sm:$0xf]  ;;  %v2117_v24 = vld [vmem:[#allocation10 + $0x14] sm:$0xf0] }
  0x6a   : > { %646 = vmatmul.bf16.vlgmr.msra.gmra.mxu0 %v504_v54  ;;  %v2121_v54 = vld [vmem:[#allocation10 + $0x34] sm:$0xf0]  ;;  %v1844_v14 = vor.u32 %v2134_v8, %v1841_v9  ;;  %v1768_v26 = vor.u32 %v2117_v24, %v1767_v23  ;;  %v2116_v28 = vld [vmem:[#allocation10 + $0x14] sm:$0xf]  ;;  %v1759_v35 = vld [vmem:[#allocation10] sm:$0xf] }
  0x6b   : > { %659 = vmatmul.bf16.vlgmr.msra.gmra.mxu1 %v505_v55  ;;  %775 = vmatpush.bf16.msra.mxu2 %v1696_v1  ;;  %v1847_v55 = vld [vmem:[#allocation10 + $0xb0] sm:$0xf]  ;;  %v1784_v62 = vor.u32 %v2121_v54, %v1783_v53  ;;  %v1775_v1 = vld [vmem:[#allocation10 + $0x20] sm:$0xf]  ;;  %v2133_v27 = vld [vmem:[#allocation10 + $0x94] sm:$0xf0] }
  0x6c   : > { %788 = vmatpush.bf16.msra.mxu3 %v1700_v3  ;;  %996 = vmatpush.bf16.msrb.mxu0 %v1816_v7  ;;  %v1848_v63 = vor.u32 %v2137_v57, %v1847_v55  ;;  %v1839_v3 = vld [vmem:[#allocation10 + $0xa0] sm:$0xf]  ;;  %v1777_v7 = vld [vmem:[#allocation10 + $0x28] sm:$0xf0]  ;;  %v1776_v10 = vor.u32 %v2119_v2, %v1775_v1  ;;  %v2132_v32 = vld [vmem:[#allocation10 + $0x94] sm:$0xf] }
  0x6d   : > { %1009 = vmatpush.bf16.msrb.mxu1 %v1880_v11  ;;  %v2305_v11 = vld [vmem:[#allocation7] ss:$0 sm:$0xff]  ;;  %v1780_v13 = vor.u32 %v2118_v6, %v1777_v7  ;;  %v2115_v36 = vld [vmem:[#allocation10 + $0x4] sm:$0xf0]  ;;  %v2114_v40 = vld [vmem:[#allocation10 + $0x4] sm:$0xf] }
  0x6e   : > { %v2131_v39 = vld [vmem:[#allocation10 + $0x84] sm:$0xf0]  ;;  %v1761_v41 = vld [vmem:[#allocation10 + $0x8] sm:$0xf0]  ;;  %v2130_v44 = vld [vmem:[#allocation10 + $0x84] sm:$0xf] }
  0x6f   : > { %1022 = vmatpush.bf16.msrb.mxu2 %v1820_v12  ;;  %v1840_v12 = vor.u32 %v2135_v5, %v1839_v3  ;;  %v1764_v43 = vor.u32 %v2114_v40, %v1761_v41  ;;  %v1825_v45 = vld [vmem:[#allocation10 + $0x88] sm:$0xf0]  ;;  %v1943_v47 = vld [vmem:[#allocation11 + $0x70] sm:$0xf]  ;;  %v1945_v53 = vld [vmem:[#allocation11 + $0x78] sm:$0xf0] }
  0x70   : > { %1035 = vmatpush.bf16.msrb.mxu3 %v1884_v16  ;;  %997 = vmatpush.bf16.msrb.mxu0 %v1808_v20  ;;  %v1828_v46 = vor.u32 %v2130_v44, %v1825_v45  ;;  %v1935_v54 = vld [vmem:[#allocation11 + $0x60] sm:$0xf]  ;;  %v2159_v55 = vld [vmem:[#allocation11 + $0x64] sm:$0xf0]  ;;  %v2158_v57 = vld [vmem:[#allocation11 + $0x64] sm:$0xf] }
  0x71   : > { %1010 = vmatpush.bf16.msrb.mxu1 %v1872_v21  ;;  %v1937_v58 = vld [vmem:[#allocation11 + $0x68] sm:$0xf0]  ;;  %v2007_v59 = vld [vmem:[#allocation11 + $0xf0] sm:$0xf]  ;;  %v1936_v60 = vor.u32 %v2159_v55, %v1935_v54  ;;  %v2177_v61 = vld [vmem:[#allocation11 + $0xf4] sm:$0xf0] }
  0x72   : > { %v2008_v1 = vor.u32 %v2177_v61, %v2007_v59  ;;  %v1927_v3 = vld [vmem:[#allocation11 + $0x50] sm:$0xf]  ;;  %v2156_v5 = vld [vmem:[#allocation11 + $0x54] sm:$0xf]  ;;  %v1929_v6 = vld [vmem:[#allocation11 + $0x58] sm:$0xf0] }
  0x73   : > { %1023 = vmatpush.bf16.msrb.mxu2 %v1812_v25  ;;  %v1831_v25 = vld [vmem:[#allocation10 + $0x90] sm:$0xf]  ;;  %v1999_v7 = vld [vmem:[#allocation11 + $0xe0] sm:$0xf]  ;;  %v2175_v8 = vld [vmem:[#allocation11 + $0xe4] sm:$0xf0] }
  0x74   : > { %1036 = vmatpush.bf16.msrb.mxu3 %v1876_v29  ;;  %998 = vmatpush.bf16.msrb.mxu0 %v1800_v33  ;;  %v1769_v29 = vld [vmem:[#allocation10 + $0x18] sm:$0xf0]  ;;  %v1832_v30 = vor.u32 %v2133_v27, %v1831_v25  ;;  %v2000_v9 = vor.u32 %v2175_v8, %v1999_v7  ;;  %v1983_v25 = vld [vmem:[#allocation11 + $0xc0] sm:$0xf]  ;;  %v2171_v27 = vld [vmem:[#allocation11 + $0xc4] sm:$0xf0] }
  0x75   : > { %1011 = vmatpush.bf16.msrb.mxu1 %v1864_v37  ;;  %v1772_v31 = vor.u32 %v2116_v28, %v1769_v29  ;;  %v1833_v33 = vld [vmem:[#allocation10 + $0x98] sm:$0xf0]  ;;  %v1823_v37 = vld [vmem:[#allocation10 + $0x80] sm:$0xf]  ;;  %v2170_v28 = vld [vmem:[#allocation11 + $0xc4] sm:$0xf] }
  0x76   : > { %v1836_v34 = vor.u32 %v2132_v32, %v1833_v33  ;;  %v1985_v29 = vld [vmem:[#allocation11 + $0xc8] sm:$0xf0]  ;;  %v2153_v32 = vld [vmem:[#allocation11 + $0x34] sm:$0xf0]  ;;  %v2152_v33 = vld [vmem:[#allocation11 + $0x34] sm:$0xf] }
  0x77   : > { %1024 = vmatpush.bf16.msrb.mxu2 %v1804_v38  ;;  %v1760_v38 = vor.u32 %v2115_v36, %v1759_v35  ;;  %v1984_v35 = vor.u32 %v2171_v27, %v1983_v25  ;;  %v1988_v36 = vor.u32 %v2170_v28, %v1985_v29  ;;  %v2151_v40 = vld [vmem:[#allocation11 + $0x24] sm:$0xf0]  ;;  %v2150_v41 = vld [vmem:[#allocation11 + $0x24] sm:$0xf]  ;;  %v2169_v61 = vld [vmem:[#allocation11 + $0xb4] sm:$0xf0] }
  0x78   : > { %1037 = vmatpush.bf16.msrb.mxu3 %v1868_v42  ;;  %999 = vmatpush.bf16.msrb.mxu0 %v1792_v48  ;;  %v1824_v42 = vor.u32 %v2131_v39, %v1823_v37  ;;  %v2161_v48 = vld [vmem:[#allocation11 + $0x74] sm:$0xf0]  ;;  %v1903_v39 = vld [vmem:[#allocation11 + $0x20] sm:$0xf]  ;;  %v2163_v27 = vld [vmem:[#allocation11 + $0x84] sm:$0xf0] }
  0x79   : > { %1012 = vmatpush.bf16.msrb.mxu1 %v1856_v49  ;;  %v2160_v49 = vld [vmem:[#allocation11 + $0x74] sm:$0xf]  ;;  %v1904_v44 = vor.u32 %v2151_v40, %v1903_v39  ;;  %v1967_v8 = vld [vmem:[#allocation11 + $0xa0] sm:$0xf]  ;;  %v2162_v28 = vld [vmem:[#allocation11 + $0x84] sm:$0xf] }
  0x7a   : > { %v2182_v39 = vld [vmem:[#allocation13 + $0x20] sm:$0xff]  ;;  %s1480_s25 = sshll.u32 %s1476_s1, 4  ;;  %s1481_s25 = int_to_ptr.hbm [resolvable:$true] %s1480_s25 }
  0x7b   : > { %1025 = vmatpush.bf16.msrb.mxu2 %v1796_v50  ;;  %v1944_v50 = vor.u32 %v2161_v48, %v1943_v47  ;;  %s2531_s15 = sshra.s32 %s1481_s25, 4  ;;  %s2532_s15 = int_to_ptr.hbm [resolvable:$true] %s2531_s15 }
  0x7c   : > { %1038 = vmatpush.bf16.msrb.mxu3 %v1860_v56  ;;  %1000 = vmatpush.bf16.msrb.mxu0 %v1784_v62  ;;  %v1948_v56 = vor.u32 %v2160_v49, %v1945_v53  ;;  %v2176_v62 = vld [vmem:[#allocation11 + $0xf4] sm:$0xf]  ;;  %s2533_s10 = scalar_lea.hbm %s2532_s15, 8  ;;  %p2538_p12 = scmp.lt.s32.totalorder %s2532_s15, %s2912_s13 }
  0x7d   : > { %1013 = vmatpush.bf16.msrb.mxu1 %v1848_v63  ;;  %v2009_v63 = vld [vmem:[#allocation11 + $0xf8] sm:$0xf0]  ;;  %p2534_p1 = scmp.ne.s32.totalorder %s2532_s15, %s2533_s10  ;;  %p2539_p7 = scmp.lt.s32.totalorder %s2537_s14, %s2533_s10 }
  0x7e   : > { %v2012_v2 = vor.u32 %v2176_v62, %v2009_v63  ;;  %v2168_v62 = vld [vmem:[#allocation11 + $0xb4] sm:$0xf] }
  0x7f   : > { %1026 = vmatpush.bf16.msrb.mxu2 %v1788_v0  ;;  %v1940_v0 = vor.u32 %v2158_v57, %v1937_v58  ;;  %p2535_p3 = pnand %p2534_p1, %p2770_p4  ;;  %p2540_p8 = por %p2539_p7, %p2538_p12 }
  0x80   : > { %1039 = vmatpush.bf16.msrb.mxu3 %v1852_v4  ;;  %1001 = vmatpush.bf16.msrb.mxu0 %v1776_v10  ;;  %v2157_v4 = vld [vmem:[#allocation11 + $0x54] sm:$0xf0]  ;;  %v2174_v10 = vld [vmem:[#allocation11 + $0xe4] sm:$0xf] }
  0x81   : > { %1014 = vmatpush.bf16.msrb.mxu1 %v1840_v12  ;;  %v1928_v12 = vor.u32 %v2157_v4, %v1927_v3  ;;  %v2149_v3 = vld [vmem:[#allocation11 + $0x14] sm:$0xf0]  ;;  %v2148_v4 = vld [vmem:[#allocation11 + $0x14] sm:$0xf]  ;;  %p2536_p5 = pneg %p2535_p3 }
  0x83   : > { %1027 = vmatpush.bf16.msrb.mxu2 %v1780_v13  ;;  %p2541_p9 = pnand %p2540_p8, %p2536_p5 }
  0x84   : > { %1040 = vmatpush.bf16.msrb.mxu3 %v1844_v14  ;;  %1002 = vmatpush.bf16.msrb.mxu0 %v1768_v26  ;;  %v1919_v14 = vld [vmem:[#allocation11 + $0x40] sm:$0xf] }
  0x85   : > { %1015 = vmatpush.bf16.msrb.mxu1 %v1832_v30 }
  0x87   : > { %1028 = vmatpush.bf16.msrb.mxu2 %v1772_v31  ;;  %v1911_v31 = vld [vmem:[#allocation11 + $0x30] sm:$0xf] }
  0x88   : > { %1041 = vmatpush.bf16.msrb.mxu3 %v1836_v34  ;;  %1003 = vmatpush.bf16.msrb.mxu0 %v1760_v38  ;;  %v1913_v34 = vld [vmem:[#allocation11 + $0x38] sm:$0xf0]  ;;  %v1912_v37 = vor.u32 %v2153_v32, %v1911_v31 }
  0x89   : > { %1016 = vmatpush.bf16.msrb.mxu1 %v1824_v42  ;;  %v1916_v38 = vor.u32 %v2152_v33, %v1913_v34  ;;  %v1905_v42 = vld [vmem:[#allocation11 + $0x28] sm:$0xf0]  ;;  %v2185_v32 = vld [vmem:[#allocation13 + $0x38] sm:$0xff]  ;;  %v2184_v34 = vld [vmem:[#allocation13 + $0x30] sm:$0xff] }
  0x8a   : > { %v1908_v45 = vor.u32 %v2150_v41, %v1905_v42  ;;  %v2193_v33 = vld [vmem:[#allocation13 + $0x78] sm:$0xff] }
  0x8b   : > { %1029 = vmatpush.bf16.msrb.mxu2 %v1764_v43  ;;  %v682_v43 = vld [vmem:[%s2885_s4] sm:$0x3] }
  0x8c   : > { %1042 = vmatpush.bf16.msrb.mxu3 %v1828_v46  ;;  %1250 = vmatpush.bf16.msra.mxu0 %v1944_v50  ;;  %v684_v46 = vperm.slane %v682_v43, 0  ;;  %v685_v47 = vperm.slane %v682_v43, 1  ;;  %v2181_v41 = vld [vmem:[#allocation13 + $0x18] sm:$0xff] }
  0x8d   : > { %1263 = vmatpush.bf16.msra.mxu1 %v2008_v1 }
  0x90   : > { %1251 = vmatpush.bf16.msra.mxu0 %v1936_v60  ;;  %v1975_v60 = vld [vmem:[#allocation11 + $0xb0] sm:$0xf] }
  0x91   : > { %1264 = vmatpush.bf16.msra.mxu1 %v2000_v9  ;;  %v1976_v63 = vor.u32 %v2169_v61, %v1975_v60  ;;  %v2167_v9 = vld [vmem:[#allocation11 + $0xa4] sm:$0xf0]  ;;  %v2190_v61 = vld [vmem:[#allocation13 + $0x60] sm:$0xff] }
  0x94   : > { %1252 = vmatpush.bf16.msra.mxu0 %v1928_v12  ;;  %v1969_v12 = vld [vmem:[#allocation11 + $0xa8] sm:$0xf0] }
  0xe7   : > { %v647_v15 = vpop.f32.mrf.mxu0 }
  0xe8   : > { %v660_v16 = vpop.f32.mrf.mxu1  ;;  %v648_v17 = vadd.f32 %v2305_v11, %v647_v15  ;;  %v2001_v11 = vld [vmem:[#allocation11 + $0xe8] sm:$0xf0]  ;;  %v2155_v15 = vld [vmem:[#allocation11 + $0x44] sm:$0xf0] }
  0xe9   : > { %v2004_v13 = vor.u32 %v2174_v10, %v2001_v11  ;;  %v1920_v26 = vor.u32 %v2155_v15, %v1919_v14  ;;  %v2166_v10 = vld [vmem:[#allocation11 + $0xa4] sm:$0xf]  ;;  %v1968_v11 = vor.u32 %v2167_v9, %v1967_v8  ;;  %v1887_v14 = vld [vmem:[#allocation11] sm:$0xf]  ;;  %v2147_v15 = vld [vmem:[#allocation11 + $0x4] sm:$0xf0] }
  0xea   : > { %v661_v18 = vadd.f32 %v660_v16, %v648_v17  ;;  %v1932_v16 = vor.u32 %v2156_v5, %v1929_v6  ;;  %v1991_v17 = vld [vmem:[#allocation11 + $0xd0] sm:$0xf]  ;;  %v1897_v6 = vld [vmem:[#allocation11 + $0x18] sm:$0xf0] }
  0xeb   : > { %1253 = vmatpush.bf16.msra.mxu0 %v1920_v26  ;;  %v1900_v7 = vor.u32 %v2148_v4, %v1897_v6  ;;  %v1951_v26 = vld [vmem:[#allocation11 + $0x80] sm:$0xf] }
  0xec   : > { %v664_v19 = vmax.f32 %v661_v18, 0.0  ;;  %v2173_v18 = vld [vmem:[#allocation11 + $0xd4] sm:$0xf0]  ;;  %v1952_v29 = vor.u32 %v2163_v27, %v1951_v26 }
  0xed   : > { %v1992_v23 = vor.u32 %v2173_v18, %v1991_v17  ;;  %v1888_v17 = vor.u32 %v2147_v15, %v1887_v14  ;;  %v1889_v18 = vld [vmem:[#allocation11 + $0x8] sm:$0xf0] }
  0xee   : > { %v665_v20 = vpack.c.bf16 %v664_v19, %v664_v19  ;;  %v2172_v19 = vld [vmem:[#allocation11 + $0xd4] sm:$0xf] }
  0xef   : > { %v649_v21 = vpop.f32.mrf.mxu0  ;;  %1265 = vmatpush.bf16.msra.mxu1 %v1992_v23  ;;  %1254 = vmatpush.bf16.msra.mxu0 %v1912_v37  ;;  %v2164_v23 = vld [vmem:[#allocation11 + $0x94] sm:$0xf]  ;;  %v2191_v37 = vld [vmem:[#allocation13 + $0x68] sm:$0xff] }
  0xf0   : > { %v662_v22 = vpop.f32.mrf.mxu1  ;;  %776 = vmatmul.bf16.vlgmr.msra.gmra.mxu2 %v665_v20  ;;  %789 = vmatmul.bf16.vlgmr.msra.gmra.mxu3 %v665_v20  ;;  %v2154_v20 = vld [vmem:[#allocation11 + $0x44] sm:$0xf]  ;;  %v1921_v21 = vld [vmem:[#allocation11 + $0x48] sm:$0xf0] }
  0xf1   : > { %1276 = vmatpush.bf16.msra.mxu2 %v1948_v56  ;;  %1289 = vmatpush.bf16.msra.mxu3 %v2012_v2  ;;  %v1993_v22 = vld [vmem:[#allocation11 + $0xd8] sm:$0xf0]  ;;  %v1924_v30 = vor.u32 %v2154_v20, %v1921_v21  ;;  %v1895_v2 = vld [vmem:[#allocation11 + $0x10] sm:$0xf]  ;;  %v2165_v21 = vld [vmem:[#allocation11 + $0x94] sm:$0xf0] }
  0xf2   : > { %v1996_v24 = vor.u32 %v2172_v19, %v1993_v22  ;;  %v1896_v5 = vor.u32 %v2149_v3, %v1895_v2  ;;  %v1959_v20 = vld [vmem:[#allocation11 + $0x90] sm:$0xf]  ;;  %v2187_v2 = vld [vmem:[#allocation13 + $0x48] sm:$0xff]  ;;  %v1084_v3 = vld [vmem:[%s2889_s8] sm:$0x3] }
  0xf3   : > { %1266 = vmatpush.bf16.msra.mxu1 %v1984_v35  ;;  %1255 = vmatpush.bf16.msra.mxu0 %v1904_v44  ;;  %v1960_v22 = vor.u32 %v2165_v21, %v1959_v20  ;;  %v2192_v35 = vld [vmem:[#allocation13 + $0x70] sm:$0xff] }
  0xf5   : > { %1277 = vmatpush.bf16.msra.mxu2 %v1940_v0  ;;  %1290 = vmatpush.bf16.msra.mxu3 %v2004_v13  ;;  %v1977_v0 = vld [vmem:[#allocation11 + $0xb8] sm:$0xf0]  ;;  %v1972_v13 = vor.u32 %v2166_v10, %v1969_v12  ;;  %v1087_v10 = vperm.slane %v1084_v3, 1 }
  0xf6   : > { %v1980_v1 = vor.u32 %v2168_v62, %v1977_v0  ;;  %v2180_v62 = vld [vmem:[#allocation13 + $0x10] sm:$0xff] }
  0xf7   : > { %1267 = vmatpush.bf16.msra.mxu1 %v1976_v63  ;;  %1256 = vmatpush.bf16.msra.mxu0 %v1896_v5  ;;  %v2179_v63 = vld [vmem:[#allocation13 + $0x8] sm:$0xff]  ;;  %v2188_v0 = vld [vmem:[#allocation13 + $0x50] sm:$0xff]  ;;  %v1086_v5 = vperm.slane %v1084_v3, 0 }
  0xf9   : > { %1278 = vmatpush.bf16.msra.mxu2 %v1932_v16  ;;  %1291 = vmatpush.bf16.msra.mxu3 %v1996_v24  ;;  %v2146_v16 = vld [vmem:[#allocation11 + $0x4] sm:$0xf]  ;;  %v1961_v24 = vld [vmem:[#allocation11 + $0x98] sm:$0xf0] }
  0xfa   : > { %v1892_v19 = vor.u32 %v2146_v16, %v1889_v18  ;;  %v1964_v25 = vor.u32 %v2164_v23, %v1961_v24  ;;  %v2306_v23 = vld [vmem:[%s2911_s28] ss:$0 sm:$0xff] }
  0xfb   : > { %1268 = vmatpush.bf16.msra.mxu1 %v1968_v11  ;;  %1257 = vmatpush.bf16.msra.mxu0 %v1888_v17 }
  0xfd   : > { %1279 = vmatpush.bf16.msra.mxu2 %v1924_v30  ;;  %1292 = vmatpush.bf16.msra.mxu3 %v1988_v36  ;;  %v1953_v30 = vld [vmem:[#allocation11 + $0x88] sm:$0xf0] }
  0xfe   : > { %v1956_v31 = vor.u32 %v2162_v28, %v1953_v30  ;;  %v2183_v36 = vld [vmem:[#allocation13 + $0x28] sm:$0xff] }
  0xff   : > { %1269 = vmatpush.bf16.msra.mxu1 %v1960_v22 }
 0x101   : > { %1280 = vmatpush.bf16.msra.mxu2 %v1916_v38  ;;  %1293 = vmatpush.bf16.msra.mxu3 %v1980_v1  ;;  %v830_v38 = vld [vmem:[%s2887_s6] sm:$0x3]  ;;  %v2178_v1 = vld [vmem:[#allocation13] sm:$0xff] }
 0x102   : > { %v832_v40 = vperm.slane %v830_v38, 0 }
 0x103   : > { %1270 = vmatpush.bf16.msra.mxu1 %v1952_v29 }
 0x105   : > { %1281 = vmatpush.bf16.msra.mxu2 %v1908_v45  ;;  %1294 = vmatpush.bf16.msra.mxu3 %v1972_v13 }
 0x109   : > { %1282 = vmatpush.bf16.msra.mxu2 %v1900_v7  ;;  %1295 = vmatpush.bf16.msra.mxu3 %v1964_v25 }
 0x10d   : > { %1283 = vmatpush.bf16.msra.mxu2 %v1892_v19  ;;  %1296 = vmatpush.bf16.msra.mxu3 %v1956_v31 }
 0x173   : > { %v777_v48 = vpop.f32.mrf.mxu2  ;;  %v790_v49 = vpop.f32.mrf.mxu3 }
 0x174   : > { %v778_v50 = vadd.f32 %v777_v48, %v684_v46  ;;  %v791_v53 = vadd.f32 %v790_v49, %v685_v47  ;;  %v833_v46 = vperm.slane %v830_v38, 1 }
 0x176   : > { %v794_v54 = vmax.f32 %v778_v50, 0.0  ;;  %v795_v55 = vmax.f32 %v791_v53, 0.0 }
 0x178   : > { %v796_v56 = vpack.c.bf16 %v794_v54, %v794_v54  ;;  %v797_v57 = vpack.c.bf16 %v795_v55, %v795_v55 }
 0x17a   : > { %1004 = vmatmul.bf16.vlgmr.msrb.gmra.mxu0 %v796_v56  ;;  %1017 = vmatmul.bf16.vlgmr.msrb.gmra.mxu1 %v797_v57 }
 0x17b   : > { %1030 = vmatmul.bf16.vlgmr.msrb.gmra.mxu2 %v796_v56  ;;  %1043 = vmatmul.bf16.vlgmr.msrb.gmra.mxu3 %v797_v57  ;;  %v779_v58 = vpop.f32.mrf.mxu2  ;;  %v792_v59 = vpop.f32.mrf.mxu3 }
 0x17c   : > { %1438 = vmatpush.bf16.msrb.mxu0 %v2185_v32  ;;  %1451 = vmatpush.bf16.msrb.mxu1 %v2193_v33 }
 0x180   : > { %1439 = vmatpush.bf16.msrb.mxu0 %v2184_v34  ;;  %1452 = vmatpush.bf16.msrb.mxu1 %v2192_v35 }
 0x184   : > { %1440 = vmatpush.bf16.msrb.mxu0 %v2183_v36  ;;  %1453 = vmatpush.bf16.msrb.mxu1 %v2191_v37 }
 0x188   : > { %1441 = vmatpush.bf16.msrb.mxu0 %v2182_v39  ;;  %1454 = vmatpush.bf16.msrb.mxu1 %v2190_v61 }
 0x18c   : > { %1442 = vmatpush.bf16.msrb.mxu0 %v2181_v41 }
 0x190   : > { %1443 = vmatpush.bf16.msrb.mxu0 %v2180_v62 }
 0x194   : > { %1444 = vmatpush.bf16.msrb.mxu0 %v2179_v63 }
 0x198   : > { %1445 = vmatpush.bf16.msrb.mxu0 %v2178_v1 }
 0x1f7   : > { %v1005_v42 = vpop.f32.mrf.mxu0  ;;  %v1018_v43 = vpop.f32.mrf.mxu1 }
 0x1f8   : > { %v1006_v44 = vadd.f32 %v1005_v42, %v832_v40 }
 0x1fa   : > { %v1019_v45 = vadd.f32 %v1018_v43, %v1006_v44 }
 0x1fc   : > { %v1048_v47 = vadd.f32 %v1019_v45, %v2824_v51  ;;  %v2189_v51 = vld [vmem:[#allocation13 + $0x58] sm:$0xff] }
 0x1fd   : > { %1455 = vmatpush.bf16.msrb.mxu1 %v2189_v51 }
 0x1fe   : > { %v1050_v48 = vpack.c.bf16 %v1048_v47, %v1048_v47  ;;  %v1031_v49 = vpop.f32.mrf.mxu2  ;;  %v1044_v50 = vpop.f32.mrf.mxu3 }
 0x1ff   : > { %v1032_v53 = vadd.f32 %v1031_v49, %v833_v46  ;;  %v1007_v54 = vpop.f32.mrf.mxu0  ;;  %v1020_v55 = vpop.f32.mrf.mxu1 }
 0x200   : > { %1258 = vmatmul.bf16.vlgmr.msra.gmra.mxu0 %v1050_v48  ;;  %1284 = vmatmul.bf16.vlgmr.msra.gmra.mxu2 %v1050_v48 }
 0x201   : > { %v1045_v56 = vadd.f32 %v1044_v50, %v1032_v53  ;;  %1456 = vmatpush.bf16.msrb.mxu1 %v2188_v0 }
 0x203   : > { %v1049_v57 = vadd.f32 %v1045_v56, %v2827_v52  ;;  %v2186_v52 = vld [vmem:[#allocation13 + $0x40] sm:$0xff] }
 0x205   : > { %v1051_v58 = vpack.c.bf16 %v1049_v57, %v1049_v57  ;;  %1457 = vmatpush.bf16.msrb.mxu1 %v2187_v2 }
 0x206   : > { %v1033_v59 = vpop.f32.mrf.mxu2  ;;  %v1046_v60 = vpop.f32.mrf.mxu3 }
 0x207   : > { %1271 = vmatmul.bf16.vlgmr.msra.gmra.mxu1 %v1051_v58  ;;  %1297 = vmatmul.bf16.vlgmr.msra.gmra.mxu3 %v1051_v58 }
 0x209   : > { %1458 = vmatpush.bf16.msrb.mxu1 %v2186_v52 }
 0x27d   : > { %v1259_v4 = vpop.f32.mrf.mxu0 }
 0x27e   : > { %v1260_v6 = vadd.f32 %v1259_v4, %v1086_v5 }
 0x283   : > { %v1285_v7 = vpop.f32.mrf.mxu2 }
 0x284   : > { %v1272_v8 = vpop.f32.mrf.mxu1  ;;  %v1286_v14 = vadd.f32 %v1285_v7, %v1087_v10 }
 0x285   : > { %v1273_v9 = vadd.f32 %v1272_v8, %v1260_v6  ;;  %v1261_v11 = vpop.f32.mrf.mxu0 }
 0x287   : > { %v1302_v12 = vmax.f32 %v1273_v9, 0.0 }
 0x289   : > { %v1304_v13 = vpack.c.bf16 %v1302_v12, %v1302_v12 }
 0x28a   : > { %v1298_v15 = vpop.f32.mrf.mxu3 }
 0x28b   : > { %v1299_v16 = vadd.f32 %v1298_v15, %v1286_v14  ;;  %1446 = vmatmul.bf16.vlgmr.msrb.gmra.mxu0 %v1304_v13  ;;  %v1287_v17 = vpop.f32.mrf.mxu2 }
 0x28c   : > { %v1274_v18 = vpop.f32.mrf.mxu1 }
 0x28d   : > { %v1303_v19 = vmax.f32 %v1299_v16, 0.0 }
 0x28f   : > { %v1305_v20 = vpack.c.bf16 %v1303_v19, %v1303_v19 }
 0x291   : > { %1459 = vmatmul.bf16.vlgmr.msrb.gmra.mxu1 %v1305_v20 }
 0x292   : > { %v1300_v21 = vpop.f32.mrf.mxu3 }
 0x308   : > { %v1447_v22 = vpop.f32.mrf.mxu0 }
 0x309   : > { %v1448_v24 = vadd.f32 %v2306_v23, %v1447_v22 }
 0x30e   : > { %v1460_v25 = vpop.f32.mrf.mxu1 }
 0x30f   : > { %v1461_v26 = vadd.f32 %v1460_v25, %v1448_v24 }
 0x310   : > { %v1449_v27 = vpop.f32.mrf.mxu0 }
 0x311   : > { %1464 = vst [vmem:[%s501_s2] sm:$0xff] %v1461_v26 }
 0x312   : > { %2544 = shalt.err (!%p2541_p9)
}
 0x313   : > { %2220 = dma.vmem_to_hbm [thread:$0]  (%p2770_p4), %s1479_s5, 128, %s1481_s25, %s1466_s24  }
 0x316   : > { %v1462_v28 = vpop.f32.mrf.mxu1 }
 0x317 PF: > { %s1492_s16 = sand.u32 1, %s2583_s17   ;;  %p2913_p10 = scmp.ge.s32.totalorder %s2595_s20, 2 }
 0x318   : > { %s1493_s28 = scalar_lea.sflag [#allocation4], %s1492_s16 }
 0x319   : > { %p2246_p13 = pnand %p2913_p10, %p2774_p6 }
 0x31b   : > { %p2247_p11 = pneg %p2246_p13 }
 0x31d   : > { %2578 = dma.done.wait (%p2247_p11), %s1493_s28, 128  }
 0x31e   : > { %2580 = vsyncadd (%p2247_p11), %s1493_s28, 4294967168  ;;  %p27_p0 = scmp.ge.s32.totalorder %s2744_s27, 4   ;;  %s2914_s17 = smov %s2587_s18 }
 0x31f   : > { %s2915_s18 = smov %s2591_s19  ;;  %s2916_s19 = smov %s2755_s21 }
 0x320   : > { %s2917_s20 = smov %s2744_s27  ;;  %29 = sbr.rel (!%p27_p0) target bundleno = 15 (0xf), region = 133 }
 0x325   :  { %1499 = vsyncpa [#allocation3], 1 }
 0x326   :  { %1501 = vsyncpa [#allocation3 + $0x1], 1 }
 0x327   :  { %1502 = vsyncpa [#allocation6], 1 }
 0x328   :  { %1503 = vsyncpa [#allocation9], 1 }
 0x329   :  { %1504 = vsyncpa [#allocation12], 1 }
 0x32a   :  { %1505 = vsyncpa [#allocation4], 1 }
 0x32b   :  { %1507 = vsyncpa [#allocation4 + $0x1], 1 }

</bundles_post_ra>
